<compile_context>
chip_gen: v7x
topology: tpu7x:2x2x1
jax: 0.10.0
libtpu: 0.0.40
codegen_flags: <defaults>
</compile_context>

<pallas_src>
import jax
import jax.numpy as jnp
from jax.experimental import pallas as pl
from jax.experimental.pallas import tpu as pltpu

_LANE = 128
_SUBLANE = 8


def _round_up(x, m):
    return -(-x // m) * m


# ----------------------------------------------------------------------------
# Pallas kernel: tiled, lane-dense affine   out = alpha * img + beta
#   ab_ref  : (rows_tile, 2)          col 0 = alpha, col 1 = beta (per (b,c) row)
#   img_ref : (rows_tile, col_tile)   lane-dense image tile
# ----------------------------------------------------------------------------
def _affine_kernel(ab_ref, img_ref, out_ref):
    ab = ab_ref[...]
    a = ab[:, 0:1]                     # (rows_tile, 1) -> lane-broadcast
    b = ab[:, 1:2]
    out_ref[...] = a * img_ref[...] + b


def _tile_plan(rows, hw):
    """Per-generation tile sizes + VMEM limit for the HBM-bound affine."""
    tile_target = 2 * 1024 * 1024           # bytes per img tile (v5e / v6e)
    vmem_limit = 48 * 1024 * 1024
    try:
        info = pltpu.get_tpu_info()
        vmem_cap = int(getattr(info, "vmem_capacity_bytes", 128 * 1024 * 1024))
        if vmem_cap <= 64 * 1024 * 1024:
            # v7x-class: 3.2 TB/s HBM wants bigger tiles, but only 64 MiB VMEM.
            tile_target = 4 * 1024 * 1024
            vmem_limit = min(vmem_limit, vmem_cap * 3 // 4)
    except Exception:
        pass                                  # fall back to safe defaults

    rows_tile = min(_round_up(rows, _SUBLANE), 256)
    col_cap = _round_up(hw, _LANE)
    col_tile = (tile_target // (rows_tile * 4)) // _LANE * _LANE
    col_tile = max(_LANE, min(col_tile, col_cap))

    n_row = pl.cdiv(rows, rows_tile)
    n_col = pl.cdiv(hw, col_tile)
    # Keep >= 2 parallel grid steps so both v7x TensorCores get work.
    if n_row * n_col == 1 and col_tile > _LANE:
        col_tile = _round_up(pl.cdiv(hw, 2), _LANE)
        n_col = pl.cdiv(hw, col_tile)

    return rows_tile, col_tile, n_row, n_col, vmem_limit


def isoexp_forward(exp, iso, img, params):
    """exp, iso: (B,1) float32 ; img: NCHW (B,4,H,W) float32."""
    B, C, H, W = img.shape
    assert C == 4, "IsoExp affine assumes C == 4 (Linear(64, 4) output features)"
    (w1e, b1e, w1i, b1i, wb, bb, wa, ba) = params

    # --- Stage 1 (plain JAX): micro-MLP producing per-(b,c) alpha/beta ----------
    # ~100 FLOPs; a Pallas launch + HBM round-trip would cost more than the work.
    e = jax.nn.relu(exp @ w1e + b1e)                      # (B, 32)
    i = jax.nn.relu(iso @ w1i + b1i)                      # (B, 32)
    # concat([e, i], 1) @ W  ==  e @ W_top + i @ W_bot   (no concat needed)
    beta = e @ wb[:32] + i @ wb[32:] + bb                 # (B, 4)
    alpha = e @ wa[:32] + i @ wa[32:] + ba                # (B, 4)

    # --- Stage 2 (Pallas): tiled affine over the unpadded (B*C, H*W) view -------
    rows = B * C
    hw = H * W
    ab = jnp.stack([alpha.reshape(rows), beta.reshape(rows)], axis=1)   # (rows, 2)
    img_flat = img.reshape(rows, hw)

    rows_tile, col_tile, n_row, n_col, vmem_limit = _tile_plan(rows, hw)

    out_flat = pl.pallas_call(
        _affine_kernel,
        out_shape=jax.ShapeDtypeStruct((rows, hw), img.dtype),
        grid_spec=pltpu.PrefetchScalarGridSpec(
            num_scalar_prefetch=0,
            grid=(n_row, n_col),
            in_specs=[
                pl.BlockSpec((rows_tile, 2), lambda i, j: (i, 0)),
                pl.BlockSpec((rows_tile, col_tile), lambda i, j: (i, j)),
            ],
            out_specs=pl.BlockSpec((rows_tile, col_tile), lambda i, j: (i, j)),
        ),
        compiler_params=pltpu.CompilerParams(
            dimension_semantics=("parallel", "parallel"),
            vmem_limit_bytes=vmem_limit,
        ),
    )(ab, img_flat)

    return out_flat.reshape(B, C, H, W)


def init_params(key):
    """Deterministic synthetic parameters matching nn.Linear shapes.
    PyTorch stores Linear weight as (out, in); we pass (in, out)."""
    ks = jax.random.split(key, 8)
    w1e = jax.random.normal(ks[0], (1, 32), jnp.float32) * 0.5
    b1e = jax.random.normal(ks[1], (32,), jnp.float32) * 0.1
    w1i = jax.random.normal(ks[2], (1, 32), jnp.float32) * 0.5
    b1i = jax.random.normal(ks[3], (32,), jnp.float32) * 0.1
    wb = jax.random.normal(ks[4], (64, 4), jnp.float32) * 0.1
    bb = jax.random.normal(ks[5], (4,), jnp.float32) * 0.1
    wa = jax.random.normal(ks[6], (64, 4), jnp.float32) * 0.1
    ba = jax.random.normal(ks[7], (4,), jnp.float32) * 0.1
    return (w1e, b1e, w1i, b1i, wb, bb, wa, ba)


def isoexp_ref(exp, iso, img, params):
    """Pure-JAX reference mirroring the PyTorch forward."""
    (w1e, b1e, w1i, b1i, wb, bb, wa, ba) = params
    e = jax.nn.relu(exp @ w1e + b1e)
    i = jax.nn.relu(iso @ w1i + b1i)
    final = jnp.concatenate([e, i], axis=1)
    beta = final @ wb + bb
    alpha = final @ wa + ba
    return alpha[:, :, None, None] * img + beta[:, :, None, None]


def _run_case(key, B, C, H, W, params):
    k_exp, k_iso, k_img = jax.random.split(key, 3)
    exp = jax.random.uniform(k_exp, (B, 1), jnp.float32)
    iso = jax.random.uniform(k_iso, (B, 1), jnp.float32)
    img = jax.random.normal(k_img, (B, C, H, W), jnp.float32)

    out = isoexp_forward(exp, iso, img, params)
    out = jax.block_until_ready(out)

    ref = isoexp_ref(exp, iso, img, params)
    assert out.shape == (B, C, H, W)
    assert jnp.allclose(out, ref, atol=1e-5, rtol=1e-5), \
        f"mismatch vs reference for shape {(B, C, H, W)}"


if __name__ == "__main__":
    key = jax.random.PRNGKey(0)
    k_par, k0, k1, k2 = jax.random.split(key, 4)
    params = init_params(k_par)

    # Primary small case from the module spec.
    _run_case(k0, B=2, C=4, H=16, W=16, params=params)
    # Non-tile-aligned case (rows=12, H*W=900) -> exercises masked boundary blocks.
    _run_case(k1, B=3, C=4, H=30, W=30, params=params)
    # Larger spatial case -> multi-step column grid.
    _run_case(k2, B=2, C=4, H=64, W=64, params=params)

    print("KERNEL_OK")
</pallas_src>

<mosaic_0001>
module attributes {stable_mosaic.version = 11 : i64} {
  func.func @_affine_kernel(%arg0: i32, %arg1: i32, %arg2: memref<8x2xf32, #tpu.memory_space<vmem>>, %arg3: memref<8x128xf32, #tpu.memory_space<vmem>>, %arg4: memref<8x128xf32, #tpu.memory_space<vmem>>) attributes {dimension_semantics = [#tpu.dimension_semantics<parallel>, #tpu.dimension_semantics<parallel>], iteration_bounds = array<i64: 1, 2>, scalar_prefetch = 0 : i64, scratch_operands = 0 : i64, tpu.core_type = #tpu.core_type<tc>, window_params = [{transform_indices = @transform_0, window_bounds = array<i64: 8, 2>}, {transform_indices = @transform_1, window_bounds = array<i64: 8, 128>}, {transform_indices = @transform_2, window_bounds = array<i64: 8, 128>}]} {
    %c0 = arith.constant 0 : index
    %c0_0 = arith.constant 0 : index
    %0 = vector.load %arg2[%c0, %c0_0] : memref<8x2xf32, #tpu.memory_space<vmem>>, vector<8x2xf32>
    %1 = vector.extract_strided_slice %0 {offsets = [0, 0], sizes = [8, 1], strides = [1, 1]} : vector<8x2xf32> to vector<8x1xf32>
    %2 = vector.extract_strided_slice %0 {offsets = [0, 1], sizes = [8, 1], strides = [1, 1]} : vector<8x2xf32> to vector<8x1xf32>
    %c0_1 = arith.constant 0 : index
    %c0_2 = arith.constant 0 : index
    %3 = vector.load %arg3[%c0_1, %c0_2] : memref<8x128xf32, #tpu.memory_space<vmem>>, vector<8x128xf32>
    %4 = vector.broadcast %1 : vector<8x1xf32> to vector<8x128xf32>
    %5 = arith.mulf %4, %3 : vector<8x128xf32>
    %6 = vector.broadcast %2 : vector<8x1xf32> to vector<8x128xf32>
    %7 = arith.addf %5, %6 : vector<8x128xf32>
    %c0_3 = arith.constant 0 : index
    %c0_4 = arith.constant 0 : index
    %8 = vector.load %arg4[%c0_3, %c0_4] : memref<8x128xf32, #tpu.memory_space<vmem>>, vector<8x128xf32>
    tpu.vector_store %arg4[%c0_3, %c0_4], %7 {strides = array<i32>} : memref<8x128xf32, #tpu.memory_space<vmem>>, vector<8x128xf32>,
    return
  }
  func.func @transform_0(%arg0: i32, %arg1: i32) -> (i32, i32) {
    %c0_i32 = arith.constant 0 : i32
    %c0_i32_0 = arith.constant 0 : i32
    return %arg0, %c0_i32 : i32, i32
  }
  func.func @transform_1(%arg0: i32, %arg1: i32) -> (i32, i32) {
    %c0_i32 = arith.constant 0 : i32
    return %arg0, %arg1 : i32, i32
  }
  func.func @transform_2(%arg0: i32, %arg1: i32) -> (i32, i32) {
    %c0_i32 = arith.constant 0 : i32
    return %arg0, %arg1 : i32, i32
  }
}

</mosaic_0001>

<bundles_post_ra>
// kernel: tpu_custom_call.1
= control target key start
LH: loop header
LB: loop body
LE: loop exit
PB: predicated region body
PF: predicated region fallthrough
CT: control target
= control target key end

     0   :  { %7 = vsyncpa [#allocation3], 0  ;;  %s709_s0 = inlined_call_operand.vmem [shape: f32[8,2], index: 0, kind: input, shape index: {}]   ;;  %s710_s1 = inlined_call_operand.hbm [shape: f32[8,256], index: 1, kind: input, shape index: {}]   ;;  %s711_s2 = inlined_call_operand.hbm [shape: f32[8,256], index: 2, kind: output, shape index: {}]  }
   0x1   :  { %9 = vsyncpa [#allocation3 + $0x1], 0 }
   0x2   :  { %10 = vsyncpa [#allocation4], 0 }
   0x3   :  { %12 = vsyncpa [#allocation4 + $0x1], 0  ;;  %s534_s9 = smov 0   ;;  %s536_s10 = smov 0  }
   0x4   :  { %s538_s11 = smov 0   ;;  %s540_s12 = smov 0  }
   0x5   :  { %s542_s13 = smov 0   ;;  %s544_s14 = smov 0  }
   0x6 LB: > { %s321_s15 = sadd.s32 4294967295, %s513_s14   ;;  %s322_s16 = sadd.s32 4294967294, %s513_s14   ;;  %s513_s14 = sphi %s544_s14, %s18_s14   ;;  %s509_s13 = sphi %s542_s13, %s727_s13   ;;  %s505_s12 = sphi %s540_s12, %s726_s12   ;;  %s501_s11 = sphi %s538_s11, %s725_s11   ;;  %s497_s10 = sphi %s536_s10, %s724_s10   ;;  %s493_s9 = sphi %s534_s9, %s723_s9  }
   0x7   : > { %s27_s17 = sadd.s32 1, %s509_s13  ;;  %s65_s18 = sadd.s32 1, %s501_s11 }
   0x8   : > { %p28_p0 = scmp.ge.s32.totalorder %s27_s17, 2  ;;  %p72_p1 = scmp.ne.s32.totalorder %s501_s11, %s497_s10 }
   0x9   : > { %p73_p2 = scmp.eq.s32.totalorder %s513_s14, 0  ;;  %p78_p3 = scmp.ne.s32.totalorder %s497_s10, %s493_s9 }
   0xa   : > { %s729_s17 = smov (%p28_p0, %s27_s17), 0  ;;  %p79_p5 = scmp.eq.s32.totalorder %s321_s15, 0 }
   0xb   : > { %p575_p4 = por %p73_p2, %p72_p1  ;;  %s61_s20 = ssub.s32 %s509_s13, %s729_s17 }
   0xc   : > { %p104_p6 = scmp.eq.s32.totalorder %s321_s15, 1  ;;  %p63_p7 = scmp.eq.s32.totalorder %s61_s20, 0 }
   0xd   : > { %p581_p8 = por %p79_p5, %p78_p3  ;;  %p110_p10 = scmp.eq.s32.totalorder %s322_s16, 1 }
   0xe   : > { %p585_p9 = por %p104_p6, %p72_p1  ;;  %p347_p13 = scmp.lt.s32.totalorder %s513_s14, 2 }
   0xf   : > { %s590_s23 = scalar_select %p63_p7, %s501_s11, %s65_s18  }
  0x10   : > { %s715_s22 = scalar_select %p585_p9, 1, 0 }
  0x11   : > { %p592_p11 = por %p110_p10, %p78_p3  ;;  %s137_s25 = sand.u32 1, %s501_s11  }
  0x12   : > { %s326_s26 = sshll.u32 %s137_s25, 3  ;;  %s327_s27 = sshll.u32 %s509_s13, 7 }
  0x13   : > { %s716_s24 = scalar_select %p592_p11, 1, 0 }
  0x14   : > { %s603_s30 = scalar_lea.hbm %s710_s1, %s327_s27  ;;  %s141_s3 = scalar_lea.vmem [#allocation2], %s326_s26 }
  0x15   : > { %s150_s4 = sshll.u32 %s141_s3, 4  ;;  %p609_p0 = pnand %p347_p13, %p575_p4  ;;  %s605_s4 = int_to_ptr.vmem [resolvable:$true] %s150_s4 }
  0x16   : > { %s138_s6 = scalar_lea.sflag [#allocation3], %s137_s25  ;;  %s401_s7 = scalar_lea.hbm %s603_s30, 128 }
  0x17   : > { %p402_p3 = scmp.ne.s32.totalorder %s603_s30, %s401_s7  ;;  %p403_p5 = pneg %p609_p0 }
  0x18   : > { %s406_s16 = scalar_lea.hbm %s710_s1, 256  ;;  %p407_p4 = scmp.lt.u32.totalorder %s603_s30, %s710_s1 }
  0x19   : > { %p404_p6 = pnand %p403_p5, %p402_p3  ;;  %p408_p10 = scmp.lt.u32.totalorder %s406_s16, %s401_s7 }
  0x1a   : > { %p410_p12 = scmp.lt.u32.totalorder %s401_s7, %s603_s30 }
  0x1b   : > { %p405_p7 = pneg %p404_p6  ;;  %p409_p13 = por %p408_p10, %p407_p4 }
  0x1d   : > { %p411_p1 = por %p410_p12, %p409_p13 }
  0x1f   : > { %p412_p2 = pnand %p411_p1, %p405_p7 }
  0x21   : > { %415 = shalt.err (!%p412_p2)
}
  0x22   : > { %s416_s20 = scalar_lea.vmem %s605_s4, 128  ;;  %s515_s25 = smov [#allocation2]  }
  0x23   : > { %p417_p3 = scmp.ne.s32.totalorder %s605_s4, %s416_s20  ;;  %s421_s26 = sshll.u32 %s515_s25, 4  ;;  %s422_s26 = int_to_ptr.vmem [resolvable:$false] %s421_s26 }
  0x24   : > { %s423_s27 = scalar_lea.vmem %s422_s26, 256  ;;  %p424_p9 = scmp.lt.s32.totalorder %s605_s4, %s422_s26 }
  0x25   : > { %p419_p6 = pnand %p417_p3, %p403_p5  ;;  %p425_p4 = scmp.lt.s32.totalorder %s423_s27, %s416_s20 }
  0x27   : > { %p420_p11 = pneg %p419_p6  ;;  %p426_p10 = por %p425_p4, %p424_p9 }
  0x29   : > { %p427_p12 = pnand %p426_p10, %p420_p11 }
  0x2b   : > { %430 = shalt.err (!%p427_p12)
}
  0x2c   : > { %342 = dma.hbm_to_vmem [thread:$0]  (!%p609_p0), %s603_s30, 128, %s605_s4, %s138_s6  }
  0x2d   : > { %p718_p1 = scmp.lt.s32.totalorder %s513_s14, 3  ;;  %p719_p2 = scmp.ge.s32.totalorder %s513_s14, 1 }
  0x2f   : > { %p156_p5 = pnand %p719_p2, %p718_p1 }
  0x30   : > { %s645_s28 = sand.u32 (!%p156_p5), 1, %s497_s10  }
  0x31   : > { %159 = sbr.rel (%p156_p5) target bundleno = 208 (0xd0), region = 28  ;;  %s329_s29 = sshll.u32 (!%p156_p5), %s645_s28, 3 }
  0x32   : > { %s162_s3 = scalar_lea.sflag (!%p156_p5), [#allocation3], %s645_s28  ;;  %s165_s7 = scalar_lea.vmem (!%p156_p5), [#allocation2], %s329_s29 }
  0x38   : > { %484 = dma.done.wait (%p581_p8), %s162_s3, 128  }
  0x39   : > { %486 = vsyncadd (%p581_p8), %s162_s3, 4294967168  ;;  %v516_v0 = vmov 0   ;;  %v194_v1 = vld [vmem:[%s709_s0] sm:$0xff]  ;;  %v517_v2 = vmov 1   ;;  %s332_s5 = sshll.u32 %s505_s12, 7  ;;  %s189_s6 = scalar_lea.vmem [#allocation5], %s329_s29 }
  0x3a   : > { %399 = vset.pattern.permute.xlu0 %v516_v0  ;;  %v195_v4 = vld [vmem:[%s165_s7] sm:$0xff]  ;;  %s224_s8 = sshll.u32 %s189_s6, 4  ;;  %s660_s16 = scalar_lea.hbm %s711_s2, %s332_s5  ;;  %s662_s8 = int_to_ptr.vmem [resolvable:$true] %s224_s8 }
  0x3b   : > { %198 = vperm.xlu0 %399, %v194_v1   ;;  %s209_s18 = scalar_lea.sflag [#allocation4], %s645_s28  ;;  %s431_s19 = scalar_lea.vmem %s662_s8, 128 }
  0x3c   : > { %p432_p8 = scmp.ne.s32.totalorder %s662_s8, %s431_s19  ;;  %p720_p9 = scmp.ne.s32.totalorder %s715_s22, 0 }
  0x3d   : > { %s518_s12 = smov [#allocation5]  }
  0x3e   : > { %p433_p11 = pnand %p432_p8, %p720_p9  ;;  %s435_s20 = sshll.u32 %s518_s12, 4  ;;  %s436_s20 = int_to_ptr.vmem [resolvable:$false] %s435_s20 }
  0x3f   : > { %400 = vset.pattern.permute.xlu0 %v517_v2  ;;  %s437_s25 = scalar_lea.vmem %s436_s20, 256  ;;  %p438_p7 = scmp.lt.s32.totalorder %s662_s8, %s436_s20 }
  0x40   : > { %203 = vperm.xlu0 %400, %v194_v1   ;;  %p434_p0 = pneg %p433_p11  ;;  %p439_p13 = scmp.lt.s32.totalorder %s437_s25, %s431_s19 }
  0x42   : > { %p440_p3 = por %p439_p13, %p438_p7 }
  0x44   : > { %p441_p6 = pnand %p440_p3, %p434_p0 }
  0xba   : > { %v199_v3 = vpop.permute.xlu0 %198 }
  0xbb   : > { %v201_v5 = vmul.f32 %v199_v3, %v195_v4 }
  0xbf   : > { %v204_v6 = vpop.permute.xlu0 %203 }
  0xc0   : > { %v206_v7 = vadd.f32 %v204_v6, %v201_v5 }
  0xc2   : > { %207 = vst [vmem:[%s189_s6] sm:$0xff] %v206_v7 }
  0xc3   : > { %444 = shalt.err (!%p441_p6)
}
  0xc4   : > { %s445_s26 = scalar_lea.hbm %s660_s16, 128  ;;  %s449_s29 = scalar_lea.hbm %s711_s2, 256 }
  0xc5   : > { %p446_p4 = scmp.ne.s32.totalorder %s660_s16, %s445_s26  ;;  %p450_p1 = scmp.lt.u32.totalorder %s660_s16, %s711_s2 }
  0xc6   : > { %p451_p2 = scmp.lt.u32.totalorder %s449_s29, %s445_s26  ;;  %p453_p8 = scmp.lt.u32.totalorder %s445_s26, %s660_s16 }
  0xc7   : > { %p447_p10 = pnand %p446_p4, %p720_p9 }
  0xc8   : > { %p452_p5 = por %p451_p2, %p450_p1 }
  0xc9   : > { %p448_p12 = pneg %p447_p10 }
  0xca   : > { %p454_p11 = por %p453_p8, %p452_p5 }
  0xcc   : > { %p455_p0 = pnand %p454_p11, %p448_p12 }
  0xce   : > { %458 = shalt.err (!%p455_p0)
}
  0xcf   : > { %337 = dma.vmem_to_hbm [thread:$0]  (%p720_p9), %s662_s8, 128, %s660_s16, %s209_s18  }
  0xd0 PF: > { %s236_s30 = sand.u32 1, %s493_s9   ;;  %p721_p7 = scmp.ne.s32.totalorder %s716_s24, 0 }
  0xd1   : > { %p722_p13 = scmp.ge.s32.totalorder %s513_s14, 2  ;;  %s237_s4 = scalar_lea.sflag [#allocation4], %s236_s30 }
  0xd3   : > { %p344_p3 = pnand %p722_p13, %p721_p7 }
  0xd5   : > { %488 = dma.done.wait (!%p344_p3), %s237_s4, 128  }
  0xd6   : > { %490 = vsyncadd (!%p344_p3), %s237_s4, 4294967168  ;;  %s18_s14 = sadd.s32 1, %s513_s14   ;;  %s723_s9 = smov %s497_s10 }
  0xd7   : > { %p15_p6 = scmp.ge.s32.totalorder %s18_s14, 4   ;;  %s724_s10 = smov %s501_s11 }
  0xd8   : > { %s725_s11 = smov %s590_s23  ;;  %s726_s12 = smov %s509_s13 }
  0xd9   : > { %s727_s13 = smov %s729_s17  ;;  %17 = sbr.rel (!%p15_p6) target bundleno = 6 (0x6), region = 76 }
  0xe0   :  { %242 = vsyncpa [#allocation3], 1 }
  0xe1   :  { %244 = vsyncpa [#allocation3 + $0x1], 1 }
  0xe2   :  { %245 = vsyncpa [#allocation4], 1 }
  0xe3   :  { %247 = vsyncpa [#allocation4 + $0x1], 1 }

</bundles_post_ra>
